<compile_context>
chip_gen: v6e
topology: v6e:2x2x1
jax: 0.10.0
libtpu: 0.0.40
codegen_flags: <defaults>
</compile_context>

<pallas_src>
import jax
import jax.numpy as jnp
from jax.experimental import pallas as pl
from jax.experimental.pallas import tpu as pltpu


def _round_up(x, m):
    return ((x + m - 1) // m) * m


def _vmem_budget_bytes():
    """Per-core VMEM budget with headroom (v7x: ~48 MiB, v5e/v6e: ~96 MiB)."""
    cap = 64 << 20  # conservative fallback = v7x per-TensorCore VMEM
    try:
        info = pltpu.get_tpu_info()
        cap = int(getattr(info, "vmem_capacity_bytes", cap)) or cap
    except Exception:
        pass
    return (cap * 3) // 4


def _maxout_kernel(x_ref, w_ref, b_ref, o_ref):
    # x: [tm, K], w: [K, 2*tn] = [W1 tile j | W2 tile j], b: [1, 2*tn].
    acc = jnp.dot(x_ref[...], w_ref[...],
                  preferred_element_type=jnp.float32) + b_ref[...]
    tn = o_ref.shape[-1]
    o_ref[...] = jnp.maximum(acc[:, :tn], acc[:, tn:]).astype(o_ref.dtype)


def _maxout_kernel_ktiled(x_ref, w_ref, b_ref, o_ref, acc_ref):
    # K-tiled variant: f32 accumulator scratch, bias + lane-half max at k==last.
    k = pl.program_id(2)

    @pl.when(k == 0)
    def _():
        acc_ref[...] = jnp.zeros_like(acc_ref)

    acc_ref[...] += jnp.dot(x_ref[...], w_ref[...],
                            preferred_element_type=jnp.float32)

    @pl.when(k == pl.num_programs(2) - 1)
    def _():
        acc = acc_ref[...] + b_ref[...]
        tn = o_ref.shape[-1]
        o_ref[...] = jnp.maximum(acc[:, :tn], acc[:, tn:]).astype(o_ref.dtype)


def prepare_maxout_params(w1, b1, w2, b2, *, tn=256, param_dtype=jnp.float32):
    """One-time parameter prep (hoisted off the per-call hot path).

    w1, w2: [N, K] (PyTorch nn.Linear layout); b1, b2: [N].
    Returns (w_fused [K, 2*N_pad], b_fused [1, 2*N_pad], tn, N).
    N is zero-padded up to a multiple of 128 (lane-dense stores); each N-tile
    is laid out as [W1_tile_j | W2_tile_j] so one (K, 2*tn) block per grid
    step feeds a single MXU matmul.
    """
    N, K = w1.shape
    n_pad = _round_up(N, 128)
    w_item = jnp.dtype(param_dtype).itemsize

    # Lane-aligned tn that divides n_pad; keep the double-buffered weight
    # block (2 * K * 2*tn * itemsize) a modest slice of VMEM.
    tn = min(max(128, (int(tn) // 128) * 128), n_pad)
    while n_pad % tn:
        tn -= 128
    while tn > 128 and 2 * K * 2 * tn * w_item > (12 << 20):
        tn = max(128, ((tn // 2) // 128) * 128)
        while n_pad % tn:
            tn -= 128
    n_tiles = n_pad // tn

    w1t = jnp.asarray(w1, param_dtype).T          # [K, N]
    w2t = jnp.asarray(w2, param_dtype).T          # [K, N]
    b1f = jnp.asarray(b1, jnp.float32)
    b2f = jnp.asarray(b2, jnp.float32)
    if n_pad != N:
        colpad = ((0, 0), (0, n_pad - N))
        w1t = jnp.pad(w1t, colpad)
        w2t = jnp.pad(w2t, colpad)
        b1f = jnp.pad(b1f, (0, n_pad - N))
        b2f = jnp.pad(b2f, (0, n_pad - N))

    w_fused = jnp.concatenate(
        [w1t.reshape(K, n_tiles, 1, tn), w2t.reshape(K, n_tiles, 1, tn)],
        axis=2).reshape(K, 2 * n_pad)
    b_fused = jnp.concatenate(
        [b1f.reshape(n_tiles, 1, tn), b2f.reshape(n_tiles, 1, tn)],
        axis=1).reshape(1, 2 * n_pad)
    return w_fused, b_fused, tn, N


def maxout_apply(x, w_fused, b_fused, tn, n_out, *, tm=256, out_dtype=None):
    """x: [M, K] (ideally already in w_fused.dtype); returns [M, n_out]."""
    M, K = x.shape
    two_n_pad = w_fused.shape[1]
    n_pad = two_n_pad // 2
    n_tiles = n_pad // tn            # tn is fixed by the offline weight layout
    if out_dtype is None:
        out_dtype = x.dtype
    if x.dtype != w_fused.dtype:
        # Fallback only: callers should supply x in the param dtype to avoid
        # an extra HBM round trip on a bandwidth-bound op.
        x = x.astype(w_fused.dtype)

    x_item = jnp.dtype(x.dtype).itemsize
    w_item = jnp.dtype(w_fused.dtype).itemsize
    out_item = jnp.dtype(out_dtype).itemsize
    budget = _vmem_budget_bytes()

    # ---- Tile selection (tn fixed; tune tm and tk) ----------------------
    tm = max(8, min(tm, _round_up(M, 8)))   # shrink for tiny M (no host pad)

    def working_set(tm_, tn_, tk_):
        ws = 2 * (tm_ * tk_ * x_item + tk_ * 2 * tn_ * w_item + 2 * tn_ * 4)
        ws += 2 * tm_ * tn_ * out_item
        if tk_ != K:
            ws += tm_ * 2 * tn_ * 4   # f32 accumulator scratch
        return ws

    tk = K
    # K-axis tiling (accumulator) when the full-K blocks don't fit — matters
    # mainly on v7x's 64 MiB VMEM with large input_size.
    if working_set(tm, tn, tk) > budget and K % 256 == 0:
        while working_set(tm, tn, tk) > budget and tk % 256 == 0 and tk > 256:
            tk //= 2
    while working_set(tm, tn, tk) > budget and tm > 8:
        tm = max(8, _round_up(tm // 2, 8))

    m_tiles = pl.cdiv(M, tm)
    k_tiles = K // tk
    vmem_limit = int(min(budget, max(32 << 20,
                                     working_set(tm, tn, tk) * 5 // 4)))

    # Weight is streamed once when K is untiled (inner-axis invariant), else
    # once per row tile; x is streamed once per column tile.
    w_stream = 1 if k_tiles == 1 else m_tiles
    cost = pl.CostEstimate(
        flops=2 * M * K * 2 * n_pad + 3 * M * n_pad,
        transcendentals=0,
        bytes_accessed=(n_tiles * M * K * x_item
                        + w_stream * K * 2 * n_pad * w_item
                        + 2 * n_pad * 4
                        + M * n_pad * out_item),
    )

    if k_tiles == 1:
        # Grid order: column tiles outer, row tiles inner -> the fused weight
        # tile is invariant along the inner axis and is DMA'd once per j.
        grid = (n_tiles, m_tiles)
        in_specs = [
            pl.BlockSpec((tm, K), lambda j, i: (i, 0)),        # x row tile
            pl.BlockSpec((K, 2 * tn), lambda j, i: (0, j)),    # [W1|W2] tile
            pl.BlockSpec((1, 2 * tn), lambda j, i: (0, j)),    # fused bias
        ]
        out_spec = pl.BlockSpec((tm, tn), lambda j, i: (i, j))
        kernel = _maxout_kernel
        scratch = []
        semantics = ("parallel", "parallel")
    else:
        grid = (n_tiles, m_tiles, k_tiles)
        in_specs = [
            pl.BlockSpec((tm, tk), lambda j, i, k: (i, k)),
            pl.BlockSpec((tk, 2 * tn), lambda j, i, k: (k, j)),
            pl.BlockSpec((1, 2 * tn), lambda j, i, k: (0, j)),
        ]
        out_spec = pl.BlockSpec((tm, tn), lambda j, i, k: (i, j))
        kernel = _maxout_kernel_ktiled
        scratch = [pltpu.VMEM((tm, 2 * tn), jnp.float32)]
        semantics = ("parallel", "parallel", "arbitrary")

    out = pl.pallas_call(
        kernel,
        out_shape=jax.ShapeDtypeStruct((M, n_pad), out_dtype),
        grid_spec=pltpu.PrefetchScalarGridSpec(
            num_scalar_prefetch=0,
            grid=grid,
            in_specs=in_specs,
            out_specs=out_spec,
            scratch_shapes=scratch,
        ),
        compiler_params=pltpu.CompilerParams(
            dimension_semantics=semantics,
            vmem_limit_bytes=vmem_limit,
        ),
        cost_estimate=cost,
    )(x, w_fused, b_fused)

    if n_out != n_pad:
        out = out[:, :n_out]   # drop offline N padding (lane-dense in-kernel)
    return out


if __name__ == "__main__":
    # Small shapes consistent with the module: batch=2, seq=8 -> M=16 rows,
    # input_size=32, hidden_size=32.
    batch, seq, input_size, hidden_size = 2, 8, 32, 32
    M = batch * seq

    key = jax.random.PRNGKey(0)
    kx, kw1, kb1, kw2, kb2 = jax.random.split(key, 5)

    x = jax.random.normal(kx, (M, input_size), dtype=jnp.float32)
    # PyTorch nn.Linear parameter shapes: W [hidden, input], b [hidden].
    w1 = jax.random.normal(kw1, (hidden_size, input_size), dtype=jnp.float32) * 0.1
    b1 = jax.random.normal(kb1, (hidden_size,), dtype=jnp.float32) * 0.1
    w2 = jax.random.normal(kw2, (hidden_size, input_size), dtype=jnp.float32) * 0.1
    b2 = jax.random.normal(kb2, (hidden_size,), dtype=jnp.float32) * 0.1

    # Reference (same math as the PyTorch module: Linear x2 + elementwise max).
    ref = jnp.maximum(x @ w1.T + b1, x @ w2.T + b2)

    # f32 path (tight tolerance).
    w_f32, b_f32, tn32, n_out32 = prepare_maxout_params(
        w1, b1, w2, b2, param_dtype=jnp.float32)
    out = jax.block_until_ready(maxout_apply(x, w_f32, b_f32, tn32, n_out32))
    assert out.shape == (M, hidden_size)
    assert jnp.allclose(out, ref, atol=1e-4, rtol=1e-4)

    # bf16 params + bf16 activations (caller supplies the cast), f32 accumulate.
    w_b16, b_b16, tn16, n_out16 = prepare_maxout_params(
        w1, b1, w2, b2, param_dtype=jnp.bfloat16)
    x_b16 = x.astype(jnp.bfloat16)
    out16 = jax.block_until_ready(maxout_apply(x_b16, w_b16, b_b16, tn16, n_out16))
    assert out16.shape == (M, hidden_size)
    assert jnp.allclose(out16.astype(jnp.float32), ref, atol=5e-2, rtol=5e-2)

    # TODO(synk): fp8 weight path for v7x (MXU fp8) not implemented; bf16 is the
    # smallest param dtype exercised here.
    print("KERNEL_OK")
</pallas_src>

<mosaic_0001>
module attributes {stable_mosaic.version = 11 : i64} {
  func.func @_maxout_kernel(%arg0: i32, %arg1: i32, %arg2: memref<16x32xf32, #tpu.memory_space<vmem>>, %arg3: memref<32x256xf32, #tpu.memory_space<vmem>>, %arg4: memref<1x256xf32, #tpu.memory_space<vmem>>, %arg5: memref<16x128xf32, #tpu.memory_space<vmem>>) attributes {dimension_semantics = [#tpu.dimension_semantics<parallel>, #tpu.dimension_semantics<parallel>], iteration_bounds = array<i64: 1, 1>, scalar_prefetch = 0 : i64, scratch_operands = 0 : i64, tpu.core_type = #tpu.core_type<tc>, window_params = [{transform_indices = @transform_0, window_bounds = array<i64: 16, 32>}, {transform_indices = @transform_1, window_bounds = array<i64: 32, 256>}, {transform_indices = @transform_2, window_bounds = array<i64: 1, 256>}, {transform_indices = @transform_3, window_bounds = array<i64: 16, 128>}]} {
    %c0 = arith.constant 0 : index
    %c0_0 = arith.constant 0 : index
    %0 = vector.load %arg2[%c0, %c0_0] : memref<16x32xf32, #tpu.memory_space<vmem>>, vector<16x32xf32>
    %c0_1 = arith.constant 0 : index
    %c0_2 = arith.constant 0 : index
    %1 = vector.load %arg3[%c0_1, %c0_2] : memref<32x256xf32, #tpu.memory_space<vmem>>, vector<32x256xf32>
    %cst = arith.constant dense<0.000000e+00> : vector<16x256xf32>
    %2 = tpu.matmul %0, %1, %cst {dimension_numbers = #tpu.dot_dimension_numbers<[1], [0], [0], [1], [0, 0, 1, 1], [], []>} : vector<16x32xf32>, vector<32x256xf32>, vector<16x256xf32> -> vector<16x256xf32>
    %c0_3 = arith.constant 0 : index
    %c0_4 = arith.constant 0 : index
    %3 = vector.load %arg4[%c0_3, %c0_4] : memref<1x256xf32, #tpu.memory_space<vmem>>, vector<1x256xf32>
    %4 = vector.broadcast %3 : vector<1x256xf32> to vector<16x256xf32>
    %5 = arith.addf %2, %4 : vector<16x256xf32>
    %6 = vector.extract_strided_slice %5 {offsets = [0, 0], sizes = [16, 128], strides = [1, 1]} : vector<16x256xf32> to vector<16x128xf32>
    %7 = vector.extract_strided_slice %5 {offsets = [0, 128], sizes = [16, 128], strides = [1, 1]} : vector<16x256xf32> to vector<16x128xf32>
    %8 = arith.maximumf %6, %7 : vector<16x128xf32>
    %c0_5 = arith.constant 0 : index
    %c0_6 = arith.constant 0 : index
    %9 = vector.load %arg5[%c0_5, %c0_6] : memref<16x128xf32, #tpu.memory_space<vmem>>, vector<16x128xf32>
    tpu.vector_store %arg5[%c0_5, %c0_6], %8 {strides = array<i32>} : memref<16x128xf32, #tpu.memory_space<vmem>>, vector<16x128xf32>,
    return
  }
  func.func @transform_0(%arg0: i32, %arg1: i32) -> (i32, i32) {
    %c0_i32 = arith.constant 0 : i32
    %c0_i32_0 = arith.constant 0 : i32
    return %arg1, %c0_i32 : i32, i32
  }
  func.func @transform_1(%arg0: i32, %arg1: i32) -> (i32, i32) {
    %c0_i32 = arith.constant 0 : i32
    %c0_i32_0 = arith.constant 0 : i32
    return %c0_i32, %arg0 : i32, i32
  }
  func.func @transform_2(%arg0: i32, %arg1: i32) -> (i32, i32) {
    %c0_i32 = arith.constant 0 : i32
    %c0_i32_0 = arith.constant 0 : i32
    return %c0_i32, %arg0 : i32, i32
  }
  func.func @transform_3(%arg0: i32, %arg1: i32) -> (i32, i32) {
    %c0_i32 = arith.constant 0 : i32
    return %arg1, %arg0 : i32, i32
  }
}

</mosaic_0001>

<bundles_post_ra>
// kernel: tpu_custom_call.1
= control target key start
LH: loop header
LB: loop body
LE: loop exit
PB: predicated region body
PF: predicated region fallthrough
CT: control target
= control target key end

     0   :  { %8 = vsyncpa [#allocation3], 0  ;;  %s301_s0 = inlined_call_operand.hbm [shape: f32[16,32], index: 0, kind: input, shape index: {}]   ;;  %s302_s1 = inlined_call_operand.hbm [shape: f32[32,256], index: 1, kind: input, shape index: {}]   ;;  %s303_s2 = inlined_call_operand.vmem [shape: f32[1,256], index: 2, kind: input, shape index: {}]   ;;  %s304_s3 = inlined_call_operand.hbm [shape: f32[16,128], index: 3, kind: output, shape index: {}]  }
   0x1   :  { %9 = vsyncpa [#allocation6], 0 }
   0x2   :  { %10 = vsyncpa [#allocation4], 0  ;;  %s255_s12 = smov [#allocation2]  }
   0x3   :  { %s16_s13 = sshll.u32 %s255_s12, 4  ;;  %s17_s13 = int_to_ptr.vmem [resolvable:$true] %s16_s13 }
   0x4   :  { %s197_s14 = scalar_lea.vmem %s17_s13, 256  ;;  %p202_p1 = scmp.lt.s32.totalorder %s17_s13, %s17_s13 }
   0x5   :  { %p198_p0 = scmp.ne.s32.totalorder %s17_s13, %s197_s14  ;;  %p203_p2 = scmp.lt.s32.totalorder %s197_s14, %s197_s14 }
   0x7   :  { %p204_p3 = por %p203_p2, %p202_p1 }
   0x9   :  { %p205_p4 = pnand %p204_p3, %p198_p0 }
   0xb   :  { %208 = shalt.err (!%p205_p4)
}
   0xc   :  { %s256_s15 = smov 128   ;;  %s257_s16 = smov 8  }
   0xd   :  { %22 = dma.hbm_to_vmem [thread:$0]  %s301_s0, 256, %s17_s13, [#allocation3], %s256_s15, %s256_s15, %s257_s16  }
   0xe   :  { %s258_s19 = smov [#allocation5]  }
   0xf   :  { %s28_s20 = sshll.u32 %s258_s19, 4  ;;  %s29_s20 = int_to_ptr.vmem [resolvable:$true] %s28_s20 }
  0x10   :  { %s217_s21 = scalar_lea.vmem %s29_s20, 1024  ;;  %p222_p6 = scmp.lt.s32.totalorder %s29_s20, %s29_s20 }
  0x11   :  { %p218_p5 = scmp.ne.s32.totalorder %s29_s20, %s217_s21  ;;  %p223_p7 = scmp.lt.s32.totalorder %s217_s21, %s217_s21 }
  0x13   :  { %p224_p8 = por %p223_p7, %p222_p6 }
  0x15   :  { %p225_p9 = pnand %p224_p8, %p218_p5 }
  0x17   :  { %228 = shalt.err (!%p225_p9)
}
  0x18   :  { %s259_s22 = smov 256   ;;  %s260_s23 = smov 16  }
  0x19   :  { %34 = dma.hbm_to_vmem [thread:$0]  %s302_s1, 1024, %s29_s20, [#allocation6], %s259_s22, %s259_s22, %s260_s23  }
  0x1a   :  { %249 = dma.done.wait [#allocation3], 256  }
  0x1b   :  { %250 = vsyncadd [#allocation3], 4294967040 }
  0x1c   :  { %251 = dma.done.wait [#allocation6], 1024  }
  0x1d   :  { %252 = vsyncadd [#allocation6], 4294966272  ;;  %v261_v0 = vmov 0.0   ;;  %v52_v1 = vld [vmem:[#allocation5 + $0x38] sm:$0xff]  ;;  %v51_v2 = vld [vmem:[#allocation5 + $0x30] sm:$0xff]  ;;  %vm65_vm0 = vcmask 261120   ;;  %v55_v11 = vlaneseq }
  0x1e   :  { %136 = vmatprep.mubr.f32.mxu0 %v261_v0  ;;  %142 = vmatprep.mubr.f32.mxu1 %v261_v0  ;;  %v50_v3 = vld [vmem:[#allocation5 + $0x28] sm:$0xff]  ;;  %v49_v4 = vld [vmem:[#allocation5 + $0x20] sm:$0xff]  ;;  %v48_v5 = vld [vmem:[#allocation5 + $0x18] sm:$0xff]  ;;  %s262_s26 = smov [#allocation7]  }
  0x1f   :  { %96 = vmatprep.subr.mxu0 %v52_v1  ;;  %173 = vmatprep.subr.mxu1 %v52_v1  ;;  %v47_v6 = vld [vmem:[#allocation5 + $0x10] sm:$0xff]  ;;  %v46_v7 = vld [vmem:[#allocation5 + $0x8] sm:$0xff]  ;;  %v45_v8 = vld [vmem:[#allocation5] sm:$0xff]  ;;  %v56_v12 = vshrl.u32 %v55_v11, 7  ;;  %s158_s27 = sshll.u32 %s262_s26, 4  ;;  %s159_s27 = int_to_ptr.vmem [resolvable:$true] %s158_s27 }
  0x20   :  { %97 = vmatpush1.msra.mxu0 %v51_v2  ;;  %177 = vmatpush1.msra.mxu1 %v51_v2  ;;  %v43_v9 = vld [vmem:[#allocation2] sm:$0xff]  ;;  %v44_v10 = vld [vmem:[#allocation2 + $0x8] sm:$0xff]  ;;  %s229_s28 = scalar_lea.vmem %s159_s27, 256  ;;  %p234_p11 = scmp.lt.s32.totalorder %s159_s27, %s159_s27 }
  0x21   :  { %98 = vmatprep.subr.mxu0 %v50_v3  ;;  %174 = vmatprep.subr.mxu1 %v50_v3  ;;  %v57_v13 = vsub.s32 0, %v56_v12  ;;  %v61_v14 = vsub.s32 1, %v56_v12  ;;  %v53_v15 = vld [vmem:[%s303_s2] sm:$0x3]  ;;  %p230_p10 = scmp.ne.s32.totalorder %s159_s27, %s229_s28  ;;  %p235_p12 = scmp.lt.s32.totalorder %s229_s28, %s229_s28 }
  0x22   :  { %99 = vmatpush1.msra.mxu0 %v49_v4  ;;  %178 = vmatpush1.msra.mxu1 %v49_v4 }
  0x23   :  { %100 = vmatprep.subr.mxu0 %v48_v5  ;;  %175 = vmatprep.subr.mxu1 %v48_v5  ;;  %v58_v16 = vrot.slane %v53_v15, %v57_v13  ;;  %v62_v17 = vrot.slane %v53_v15, %v61_v14  ;;  %p236_p13 = por %p235_p12, %p234_p11 }
  0x24   :  { %101 = vmatpush1.msra.mxu0 %v47_v6  ;;  %179 = vmatpush1.msra.mxu1 %v47_v6 }
  0x25   :  { %102 = vmatprep.subr.mxu0 %v46_v7  ;;  %176 = vmatprep.subr.mxu1 %v46_v7  ;;  %p237_p0 = pnand %p236_p13, %p230_p10 }
  0x26   :  { %103 = vmatpush1.msra.mxu0 %v45_v8  ;;  %180 = vmatpush1.msra.mxu1 %v45_v8 }
  0x27   :  { %171 = vmatmul.mubr.msk.f32.vlgmr.msra.gmra.mxu0 %vm65_vm0, %v43_v9  ;;  %172 = vmatmul.mubr.msk.f32.vlgmr.msra.gmra.mxu1 %vm65_vm0, %v44_v10 }
  0xe7   :  { %v138_v18 = vpop.f32.mrf.mxu0  ;;  %v144_v19 = vpop.f32.mrf.mxu1 }
  0xe8   :  { %v139_v22 = vadd.f32 %v138_v18, %v58_v16  ;;  %v145_v23 = vadd.f32 %v144_v19, %v58_v16 }
  0xe9   :  { %v140_v20 = vpop.f32.mrf.mxu0  ;;  %v146_v21 = vpop.f32.mrf.mxu1 }
  0xea   :  { %v141_v24 = vadd.f32 %v140_v20, %v62_v17  ;;  %v147_v25 = vadd.f32 %v146_v21, %v62_v17 }
  0xec   :  { %v149_v26 = vmax.f32 %v139_v22, %v141_v24  ;;  %v150_v27 = vmax.f32 %v145_v23, %v147_v25 }
  0xee   :  { %151 = vst [vmem:[#allocation7] sm:$0xff] %v149_v26  ;;  %152 = vst [vmem:[#allocation7 + $0x8] sm:$0xff] %v150_v27 }
  0xef   :  { %240 = shalt.err (!%p237_p0)
}
  0xf0   :  { %164 = dma.vmem_to_hbm [thread:$0]  %s159_s27, 256, %s304_s3, [#allocation4], %s256_s15, %s256_s15, %s257_s16  }
  0xf1   :  { %253 = dma.done.wait [#allocation4], 256  }
  0xf2   :  { %254 = vsyncadd [#allocation4], 4294967040 }
  0xf3   :  { %168 = vsyncpa [#allocation3], 1 }
  0xf4   :  { %169 = vsyncpa [#allocation6], 1 }
  0xf5   :  { %170 = vsyncpa [#allocation4], 1 }

</bundles_post_ra>
